<compile_context>
chip_gen: v5e
topology: v5e:2x2
jax: 0.10.0
libtpu: 0.0.40
codegen_flags: <defaults>
</compile_context>

<pallas_src>
import jax
import jax.numpy as jnp
from jax.experimental import pallas as pl
from jax.experimental.pallas import tpu as pltpu


def _chomp_copy_kernel(x_ref, o_ref):
    # Both refs are (TR, TL) VMEM tiles over the same (row, column) window of
    # the first L_out columns; the "chomp" already happened in the BlockSpec.
    o_ref[...] = x_ref[...]


def _round_up(x: int, m: int) -> int:
    return ((x + m - 1) // m) * m


def _sublane_multiple(dtype) -> int:
    # f32 -> 8, bf16/f16 -> 16, int8/fp8 -> 32 (sub-32-bit dtypes pack along
    # sublanes; non-multiple sublane tiles force relayout copies).
    itemsize = jnp.dtype(dtype).itemsize
    return 8 * max(1, 4 // itemsize)


def _vmem_capacity_bytes() -> int:
    # Query the chip; fall back to the most conservative generation (v7x, 64 MiB).
    try:
        return int(pltpu.get_tpu_info().vmem_capacity_bytes)
    except Exception:
        return 64 * 1024 * 1024


# Target tile size in BYTES (dtype-aware): ~4 MiB keeps the copy at >=85-90%
# of HBM roofline on v5e/v6e and amortizes step overhead on v7x, while
# 2 in + 2 out double buffers (~16-20 MiB) still fit v7x's 64 MiB VMEM.
_TILE_BUDGET_BYTES = 4 * 1024 * 1024


def _choose_tiles(rows: int, l_out: int, itemsize: int):
    sub = 8 * max(1, 4 // itemsize)
    budget = _TILE_BUDGET_BYTES

    # Column tile: prefer the full (128-padded) output width — maximizes the
    # contiguous DMA stripe per row and keeps the out_spec lane-dense with at
    # most one masked column block.  Only split columns if even a sublane-high
    # full-width stripe would blow the byte budget (very long L).
    tl_full = _round_up(l_out, 128)
    if tl_full * sub * itemsize <= budget:
        tl = tl_full
    else:
        tl = max(128, ((budget // (sub * itemsize)) // 128) * 128)

    # Row tile from the remaining byte budget, rounded to the sublane multiple.
    tr_cap = max(sub, ((budget // (tl * itemsize)) // sub) * sub)
    tr = min(_round_up(rows, sub), tr_cap)
    return tr, tl, sub


def chomp1d(x: jax.Array, chomp_size: int) -> jax.Array:
    """Pallas implementation of Chomp1d.forward (x[:, :, :-chomp_size]).

    Requires chomp_size >= 1 (PyTorch's x[:, :, :-0] would be empty).
    """
    assert chomp_size > 0, "chomp_size must be >= 1 (matches PyTorch slice)"
    n, c, l = x.shape
    l_out = l - chomp_size
    assert l_out > 0, "chomp_size must be smaller than the sequence length"

    # Collapse (N, C) -> rows; tile (rows, L_out) with lane-dense blocks.
    rows = n * c
    x2d = x.reshape(rows, l)

    itemsize = jnp.dtype(x.dtype).itemsize
    tr, tl, sub = _choose_tiles(rows, l_out, itemsize)

    # Make sure a non-trivial problem exposes >= 2 parallel blocks so both
    # v7x TensorCores get work; split along rows to keep the output lane-dense.
    total_bytes = rows * l_out * itemsize
    if (pl.cdiv(rows, tr) * pl.cdiv(l_out, tl) == 1
            and total_bytes >= (1 << 20) and rows >= 2 * sub):
        tr = _round_up(pl.cdiv(rows, 2), sub)

    grid = (pl.cdiv(rows, tr), pl.cdiv(l_out, tl))

    # VMEM request: 2 in + 2 out double buffers plus slack; clamp to half the
    # physical VMEM of this generation (v7x: 32 of 64 MiB) and keep a sane floor.
    tile_bytes = tr * tl * itemsize
    vmem_cap = _vmem_capacity_bytes()
    vmem_limit = 5 * tile_bytes + (1 << 20)
    vmem_limit = max(vmem_limit, 4 << 20)
    vmem_limit = min(vmem_limit, vmem_cap // 2)
    vmem_limit = max(vmem_limit, 4 * tile_bytes)  # never below pipeline need

    out2d = pl.pallas_call(
        _chomp_copy_kernel,
        out_shape=jax.ShapeDtypeStruct((rows, l_out), x.dtype),
        grid=grid,
        # Input and output share the same block index map: block (ri, ci) of
        # the input covers exactly the same element window as block (ri, ci)
        # of the output, so the DMA performs the chomp and the body is a pure
        # copy.  Lanes past l_out in the last column block are read from valid
        # input (or OOB-padded by Pallas) but never stored.
        in_specs=[pl.BlockSpec((tr, tl), lambda ri, ci: (ri, ci))],
        out_specs=pl.BlockSpec((tr, tl), lambda ri, ci: (ri, ci)),
        compiler_params=pltpu.CompilerParams(
            dimension_semantics=("parallel", "parallel"),
            vmem_limit_bytes=int(vmem_limit),
        ),
    )(x2d)

    return out2d.reshape(n, c, l_out)


if __name__ == "__main__":
    key = jax.random.PRNGKey(0)

    # Case 1: small TCN-style activation (N, C, L) in f32, l_out < 128.
    N, C, L = 2, 4, 16
    chomp_size = 3  # (kernel_size - 1) * dilation padding to chomp
    x = jax.random.normal(key, (N, C, L), dtype=jnp.float32)
    out = jax.block_until_ready(chomp1d(x, chomp_size))
    ref = x[:, :, :-chomp_size]
    assert out.shape == (N, C, L - chomp_size), out.shape
    assert out.dtype == x.dtype
    assert jnp.array_equal(out, ref), "Pallas chomp output mismatch (f32)"

    # Case 2: bf16 with l_out > 128 (exercises the dtype-aware full-width path).
    N2, C2, L2, chomp2 = 2, 4, 200, 7
    x2 = jax.random.normal(jax.random.PRNGKey(1), (N2, C2, L2), dtype=jnp.bfloat16)
    out2 = jax.block_until_ready(chomp1d(x2, chomp2))
    ref2 = x2[:, :, :-chomp2]
    assert out2.shape == (N2, C2, L2 - chomp2), out2.shape
    assert out2.dtype == x2.dtype
    assert jnp.array_equal(out2, ref2), "Pallas chomp output mismatch (bf16)"

    print("KERNEL_OK")
</pallas_src>

<mosaic_0001>
module attributes {stable_mosaic.version = 11 : i64} {
  func.func @_chomp_copy_kernel(%arg0: i32, %arg1: i32, %arg2: memref<8x128xf32, #tpu.memory_space<vmem>>, %arg3: memref<8x128xf32, #tpu.memory_space<vmem>>) attributes {dimension_semantics = [#tpu.dimension_semantics<parallel>, #tpu.dimension_semantics<parallel>], iteration_bounds = array<i64: 1, 1>, scalar_prefetch = 0 : i64, scratch_operands = 0 : i64, tpu.core_type = #tpu.core_type<tc>, window_params = [{transform_indices = @transform_0, window_bounds = array<i64: 8, 128>}, {transform_indices = @transform_1, window_bounds = array<i64: 8, 128>}]} {
    %c0 = arith.constant 0 : index
    %c0_0 = arith.constant 0 : index
    %0 = vector.load %arg2[%c0, %c0_0] : memref<8x128xf32, #tpu.memory_space<vmem>>, vector<8x128xf32>
    %c0_1 = arith.constant 0 : index
    %c0_2 = arith.constant 0 : index
    %1 = vector.load %arg3[%c0_1, %c0_2] : memref<8x128xf32, #tpu.memory_space<vmem>>, vector<8x128xf32>
    tpu.vector_store %arg3[%c0_1, %c0_2], %0 {strides = array<i32>} : memref<8x128xf32, #tpu.memory_space<vmem>>, vector<8x128xf32>,
    return
  }
  func.func @transform_0(%arg0: i32, %arg1: i32) -> (i32, i32) {
    %c0_i32 = arith.constant 0 : i32
    return %arg0, %arg1 : i32, i32
  }
  func.func @transform_1(%arg0: i32, %arg1: i32) -> (i32, i32) {
    %c0_i32 = arith.constant 0 : i32
    return %arg0, %arg1 : i32, i32
  }
}

</mosaic_0001>

<bundles_post_ra>
// kernel: tpu_custom_call.1
= control target key start
LH: loop header
LB: loop body
LE: loop exit
PB: predicated region body
PF: predicated region fallthrough
CT: control target
= control target key end

     0   :  { %6 = vsyncpa [#allocation3], 0  ;;  %s114_s0 = inlined_call_operand.hbm [shape: f32[8,16], index: 0, kind: input, shape index: {}]   ;;  %s115_s1 = inlined_call_operand.hbm [shape: f32[8,13], index: 1, kind: output, shape index: {}]  }
   0x1   :  { %7 = vsyncpa [#allocation4], 0  ;;  %s13_s8 = sshll.u32 %s114_s0, 4  ;;  %s96_s9 = smov [#allocation2]   ;;  %s14_s8 = int_to_ptr.hbm [resolvable:$true] %s13_s8 }
   0x2   :  { %s15_s10 = sshll.u32 %s96_s9, 4  ;;  %s16_s10 = int_to_ptr.vmem [resolvable:$true] %s15_s10 }
   0x3   :  { %18 = dma.hbm_to_vmem [thread:$0]  %s14_s8, 128, %s16_s10, [#allocation3]  }
   0x4   :  { %92 = dma.done.wait [#allocation3], 128  }
   0x5   :  { %93 = vsyncadd [#allocation3], 4294967168  ;;  %s97_s11 = smov [#allocation5]   ;;  %s32_s15 = sshll.u32 %s115_s1, 4  ;;  %v23_v0 = vld [vmem:[#allocation2] sm:$0xff]  ;;  %s33_s15 = int_to_ptr.hbm [resolvable:$true] %s32_s15 }
   0x6   :  { %s30_s12 = sshll.u32 %s97_s11, 4  ;;  %24 = vst [vmem:[#allocation5] sm:$0xff] %v23_v0  ;;  %s31_s12 = int_to_ptr.vmem [resolvable:$true] %s30_s12 }
   0x7   :  { %35 = dma.vmem_to_hbm [thread:$0]  %s31_s12, 128, %s33_s15, [#allocation4]  }
   0x8   :  { %94 = dma.done.wait [#allocation4], 128  }
   0x9   :  { %95 = vsyncadd [#allocation4], 4294967168 }
   0xa   :  { %40 = vsyncpa [#allocation3], 1 }
   0xb   :  { %41 = vsyncpa [#allocation4], 1 }

</bundles_post_ra>
